<compile_context>
chip_gen: v7x
topology: tpu7x:2x2x1
jax: 0.10.0
libtpu: 0.0.40
codegen_flags: <defaults>
</compile_context>

<pallas_src>
import jax
import jax.numpy as jnp
from jax.experimental import pallas as pl
from jax.experimental.pallas import tpu as pltpu

_D_IN = 310          # CFE input feature dim (fixed by the module)
_D_IN_PAD = 384      # 310 padded up to 3 * 128 lanes
_H1 = 256
_H2 = 128
_H3 = 64
_H3_PAD = 128        # 64 padded to one full lane tile (zero cols stay zero)
_D_OUT_PAD = 128     # classifier output padded to one full lane tile


def _round_up(x, m):
    return (x + m - 1) // m * m


def _leaky_relu(x, slope=0.01):
    return jnp.where(x > 0, x, slope * x)


def dan_kernel(x_ref,
               w1_ref, b1_ref,
               w2_ref, b2_ref,
               w3_ref, b3_ref,
               wc_ref, bc_ref,
               out_ref):
    """Fused MLP: (384->256 LReLU) -> (256->128 LReLU) -> (128->128 LReLU) -> (128->128)."""
    x = x_ref[...]  # bf16 tile (tile, 384)

    h = jnp.dot(x, w1_ref[...], preferred_element_type=jnp.float32) + b1_ref[...]
    h = _leaky_relu(h)

    h = jnp.dot(h.astype(jnp.bfloat16), w2_ref[...],
                preferred_element_type=jnp.float32) + b2_ref[...]
    h = _leaky_relu(h)

    h = jnp.dot(h.astype(jnp.bfloat16), w3_ref[...],
                preferred_element_type=jnp.float32) + b3_ref[...]
    h = _leaky_relu(h)

    logits = jnp.dot(h.astype(jnp.bfloat16), wc_ref[...],
                     preferred_element_type=jnp.float32) + bc_ref[...]
    out_ref[...] = logits.astype(out_ref.dtype)


def dan_forward(x, params, *, batch_tile=256):
    """Runs the DAN forward pass. Returns (logits, loss) like the PyTorch module."""
    B, D_in = x.shape
    assert D_in == _D_IN, f"expected {_D_IN} input features, got {D_in}"
    w1, b1, w2, b2, w3, b3, wc, bc = params
    num_cat = wc.shape[1]

    # ---- host-side zero padding + dtype prep (zero padding => exact results) ----
    # weights -> bf16 for single-pass MXU feed; biases stay f32 (post-accumulation add).
    w1p = jnp.zeros((_D_IN_PAD, _H1), jnp.bfloat16).at[:D_in, :].set(w1.astype(jnp.bfloat16))
    b1p = b1.astype(jnp.float32)
    w2p = w2.astype(jnp.bfloat16)
    b2p = b2.astype(jnp.float32)
    # layer 3: pad output 64 -> 128 lanes; zero cols + zero bias stay exactly 0 through LeakyReLU
    w3p = jnp.zeros((_H2, _H3_PAD), jnp.bfloat16).at[:, :_H3].set(w3.astype(jnp.bfloat16))
    b3p = jnp.zeros((1, _H3_PAD), jnp.float32).at[:, :_H3].set(b3)
    # classifier: pad input rows 64 -> 128 (zero rows) and output cols -> 128 lanes
    wcp = jnp.zeros((_H3_PAD, _D_OUT_PAD), jnp.bfloat16).at[:_H3, :num_cat].set(wc.astype(jnp.bfloat16))
    bcp = jnp.zeros((1, _D_OUT_PAD), jnp.float32).at[:, :num_cat].set(bc)

    # Batch tile: a multiple of 8 sublanes, no bigger than the (rounded-up) batch.
    tile = min(batch_tile, _round_up(B, 8))
    tile = _round_up(tile, 8)
    B_pad = _round_up(B, tile)

    x_pad = jnp.zeros((B_pad, _D_IN_PAD), jnp.bfloat16)
    x_pad = x_pad.at[:B, :D_in].set(x.astype(jnp.bfloat16))

    grid = (B_pad // tile,)

    # constant index_map => weight/bias blocks stay resident in VMEM across grid steps
    def weight_spec(shape):
        return pl.BlockSpec(shape, lambda i: (0, 0))

    flops = 2 * B_pad * (_D_IN_PAD * _H1 + _H1 * _H2 + _H2 * _H3_PAD + _H3_PAD * _D_OUT_PAD)
    bytes_accessed = (
        x_pad.size * 2
        + (w1p.size + w2p.size + w3p.size + wcp.size) * 2
        + (b1p.size + b2p.size + b3p.size + bcp.size) * 4
        + B_pad * _D_OUT_PAD * 4
    )

    out_pad = pl.pallas_call(
        dan_kernel,
        out_shape=jax.ShapeDtypeStruct((B_pad, _D_OUT_PAD), jnp.float32),
        grid_spec=pltpu.PrefetchScalarGridSpec(
            num_scalar_prefetch=0,
            grid=grid,
            in_specs=[
                pl.BlockSpec((tile, _D_IN_PAD), lambda i: (i, 0)),  # x tile
                weight_spec(w1p.shape), weight_spec(b1p.shape),
                weight_spec(w2p.shape), weight_spec(b2p.shape),
                weight_spec(w3p.shape), weight_spec(b3p.shape),
                weight_spec(wcp.shape), weight_spec(bcp.shape),
            ],
            out_specs=pl.BlockSpec((tile, _D_OUT_PAD), lambda i: (i, 0)),
        ),
        compiler_params=pltpu.CompilerParams(
            dimension_semantics=("parallel",)),
        cost_estimate=pl.CostEstimate(
            flops=int(flops),
            transcendentals=0,
            bytes_accessed=int(bytes_accessed)),
    )(x_pad, w1p, b1p, w2p, b2p, w3p, b3p, wcp, bcp)

    logits = out_pad[:B, :num_cat]  # drop batch + lane padding (padded cols are exact zeros)

    loss = jnp.float32(0.0)  # eval-mode path
    # TODO(synk): training-mode MMD loss between source/target features not implemented.
    return logits, loss


def init_dan_params(key, number_of_category=4):
    """Deterministic init mimicking PyTorch nn.Linear default (U(-1/sqrt(fan_in), ...))."""
    dims = [(_D_IN, _H1), (_H1, _H2), (_H2, _H3), (_H3, number_of_category)]
    params = []
    for (fan_in, fan_out) in dims:
        key, kw, kb = jax.random.split(key, 3)
        bound = 1.0 / (fan_in ** 0.5)
        w = jax.random.uniform(kw, (fan_in, fan_out), jnp.float32, -bound, bound)
        b = jax.random.uniform(kb, (1, fan_out), jnp.float32, -bound, bound)
        params += [w, b]
    return tuple(params)


def dan_reference(x, params):
    """Plain-JAX f32 reference for correctness checking."""
    w1, b1, w2, b2, w3, b3, wc, bc = params
    h = _leaky_relu(x @ w1 + b1)
    h = _leaky_relu(h @ w2 + b2)
    h = _leaky_relu(h @ w3 + b3)
    return h @ wc + bc


if __name__ == "__main__":
    key = jax.random.PRNGKey(0)
    k_params, k_x = jax.random.split(key)

    number_of_category = 4
    params = init_dan_params(k_params, number_of_category)

    # data_src: [batch, 310] features (CFE input dimension is fixed by the module)
    batch = 16
    x = jax.random.normal(k_x, (batch, _D_IN), dtype=jnp.float32)

    logits, loss = dan_forward(x, params)  # tiny batch -> single grid step
    logits = jax.block_until_ready(logits)

    ref = dan_reference(x, params)
    assert logits.shape == (batch, number_of_category)
    # bf16 operands / f32 accumulation: allow small relative error vs. f32 reference
    assert jnp.allclose(logits, ref, atol=3e-2, rtol=3e-2), "mismatch vs reference"
    assert float(loss) == 0.0

    print("KERNEL_OK")
</pallas_src>

<mosaic_0001>
module attributes {stable_mosaic.version = 11 : i64} {
  func.func @dan_kernel(%arg0: i32, %arg1: memref<16x384xbf16, #tpu.memory_space<vmem>>, %arg2: memref<384x256xbf16, #tpu.memory_space<vmem>>, %arg3: memref<1x256xf32, #tpu.memory_space<vmem>>, %arg4: memref<256x128xbf16, #tpu.memory_space<vmem>>, %arg5: memref<1x128xf32, #tpu.memory_space<vmem>>, %arg6: memref<128x128xbf16, #tpu.memory_space<vmem>>, %arg7: memref<1x128xf32, #tpu.memory_space<vmem>>, %arg8: memref<128x128xbf16, #tpu.memory_space<vmem>>, %arg9: memref<1x128xf32, #tpu.memory_space<vmem>>, %arg10: memref<16x128xf32, #tpu.memory_space<vmem>>) attributes {dimension_semantics = [#tpu.dimension_semantics<parallel>], iteration_bounds = array<i64: 1>, scalar_prefetch = 0 : i64, scratch_operands = 0 : i64, tpu.core_type = #tpu.core_type<tc>, window_params = [{transform_indices = @transform_0, window_bounds = array<i64: 16, 384>}, {pipeline_mode = #tpu.pipeline_mode<synchronous>, transform_indices = @transform_1, window_bounds = array<i64: 384, 256>}, {pipeline_mode = #tpu.pipeline_mode<synchronous>, transform_indices = @transform_2, window_bounds = array<i64: 1, 256>}, {pipeline_mode = #tpu.pipeline_mode<synchronous>, transform_indices = @transform_3, window_bounds = array<i64: 256, 128>}, {pipeline_mode = #tpu.pipeline_mode<synchronous>, transform_indices = @transform_4, window_bounds = array<i64: 1, 128>}, {pipeline_mode = #tpu.pipeline_mode<synchronous>, transform_indices = @transform_5, window_bounds = array<i64: 128, 128>}, {pipeline_mode = #tpu.pipeline_mode<synchronous>, transform_indices = @transform_6, window_bounds = array<i64: 1, 128>}, {pipeline_mode = #tpu.pipeline_mode<synchronous>, transform_indices = @transform_7, window_bounds = array<i64: 128, 128>}, {pipeline_mode = #tpu.pipeline_mode<synchronous>, transform_indices = @transform_8, window_bounds = array<i64: 1, 128>}, {transform_indices = @transform_9, window_bounds = array<i64: 16, 128>}]} {
    %c0 = arith.constant 0 : index
    %c0_0 = arith.constant 0 : index
    %0 = vector.load %arg1[%c0, %c0_0] : memref<16x384xbf16, #tpu.memory_space<vmem>>, vector<16x384xbf16>
    %c0_1 = arith.constant 0 : index
    %c0_2 = arith.constant 0 : index
    %1 = vector.load %arg2[%c0_1, %c0_2] : memref<384x256xbf16, #tpu.memory_space<vmem>>, vector<384x256xbf16>
    %cst = arith.constant dense<0.000000e+00> : vector<16x256xf32>
    %2 = tpu.matmul %0, %1, %cst {dimension_numbers = #tpu.dot_dimension_numbers<[1], [0], [0], [1], [0, 0, 1, 1], [], []>} : vector<16x384xbf16>, vector<384x256xbf16>, vector<16x256xf32> -> vector<16x256xf32>
    %c0_3 = arith.constant 0 : index
    %c0_4 = arith.constant 0 : index
    %3 = vector.load %arg3[%c0_3, %c0_4] : memref<1x256xf32, #tpu.memory_space<vmem>>, vector<1x256xf32>
    %4 = vector.broadcast %3 : vector<1x256xf32> to vector<16x256xf32>
    %5 = arith.addf %2, %4 : vector<16x256xf32>
    %cst_5 = arith.constant 0.000000e+00 : f32
    %6 = vector.broadcast %cst_5 : f32 to vector<16x256xf32>
    %7 = arith.cmpf ogt, %5, %6 : vector<16x256xf32>
    %cst_6 = arith.constant 0.00999999977 : f32
    %8 = vector.broadcast %cst_6 : f32 to vector<16x256xf32>
    %9 = arith.mulf %8, %5 : vector<16x256xf32>
    %10 = arith.select %7, %5, %9 : vector<16x256xi1>, vector<16x256xf32>
    %11 = arith.truncf %10 : vector<16x256xf32> to vector<16x256xbf16>
    %c0_7 = arith.constant 0 : index
    %c0_8 = arith.constant 0 : index
    %12 = vector.load %arg4[%c0_7, %c0_8] : memref<256x128xbf16, #tpu.memory_space<vmem>>, vector<256x128xbf16>
    %cst_9 = arith.constant dense<0.000000e+00> : vector<16x128xf32>
    %13 = tpu.matmul %11, %12, %cst_9 {dimension_numbers = #tpu.dot_dimension_numbers<[1], [0], [0], [1], [0, 0, 1, 1], [], []>} : vector<16x256xbf16>, vector<256x128xbf16>, vector<16x128xf32> -> vector<16x128xf32>
    %c0_10 = arith.constant 0 : index
    %c0_11 = arith.constant 0 : index
    %14 = vector.load %arg5[%c0_10, %c0_11] : memref<1x128xf32, #tpu.memory_space<vmem>>, vector<1x128xf32>
    %15 = vector.broadcast %14 : vector<1x128xf32> to vector<16x128xf32>
    %16 = arith.addf %13, %15 : vector<16x128xf32>
    %cst_12 = arith.constant 0.000000e+00 : f32
    %17 = vector.broadcast %cst_12 : f32 to vector<16x128xf32>
    %18 = arith.cmpf ogt, %16, %17 : vector<16x128xf32>
    %cst_13 = arith.constant 0.00999999977 : f32
    %19 = vector.broadcast %cst_13 : f32 to vector<16x128xf32>
    %20 = arith.mulf %19, %16 : vector<16x128xf32>
    %21 = arith.select %18, %16, %20 : vector<16x128xi1>, vector<16x128xf32>
    %22 = arith.truncf %21 : vector<16x128xf32> to vector<16x128xbf16>
    %c0_14 = arith.constant 0 : index
    %c0_15 = arith.constant 0 : index
    %23 = vector.load %arg6[%c0_14, %c0_15] : memref<128x128xbf16, #tpu.memory_space<vmem>>, vector<128x128xbf16>
    %cst_16 = arith.constant dense<0.000000e+00> : vector<16x128xf32>
    %24 = tpu.matmul %22, %23, %cst_16 {dimension_numbers = #tpu.dot_dimension_numbers<[1], [0], [0], [1], [0, 0, 1, 1], [], []>} : vector<16x128xbf16>, vector<128x128xbf16>, vector<16x128xf32> -> vector<16x128xf32>
    %c0_17 = arith.constant 0 : index
    %c0_18 = arith.constant 0 : index
    %25 = vector.load %arg7[%c0_17, %c0_18] : memref<1x128xf32, #tpu.memory_space<vmem>>, vector<1x128xf32>
    %26 = vector.broadcast %25 : vector<1x128xf32> to vector<16x128xf32>
    %27 = arith.addf %24, %26 : vector<16x128xf32>
    %cst_19 = arith.constant 0.000000e+00 : f32
    %28 = vector.broadcast %cst_19 : f32 to vector<16x128xf32>
    %29 = arith.cmpf ogt, %27, %28 : vector<16x128xf32>
    %cst_20 = arith.constant 0.00999999977 : f32
    %30 = vector.broadcast %cst_20 : f32 to vector<16x128xf32>
    %31 = arith.mulf %30, %27 : vector<16x128xf32>
    %32 = arith.select %29, %27, %31 : vector<16x128xi1>, vector<16x128xf32>
    %33 = arith.truncf %32 : vector<16x128xf32> to vector<16x128xbf16>
    %c0_21 = arith.constant 0 : index
    %c0_22 = arith.constant 0 : index
    %34 = vector.load %arg8[%c0_21, %c0_22] : memref<128x128xbf16, #tpu.memory_space<vmem>>, vector<128x128xbf16>
    %cst_23 = arith.constant dense<0.000000e+00> : vector<16x128xf32>
    %35 = tpu.matmul %33, %34, %cst_23 {dimension_numbers = #tpu.dot_dimension_numbers<[1], [0], [0], [1], [0, 0, 1, 1], [], []>} : vector<16x128xbf16>, vector<128x128xbf16>, vector<16x128xf32> -> vector<16x128xf32>
    %c0_24 = arith.constant 0 : index
    %c0_25 = arith.constant 0 : index
    %36 = vector.load %arg9[%c0_24, %c0_25] : memref<1x128xf32, #tpu.memory_space<vmem>>, vector<1x128xf32>
    %37 = vector.broadcast %36 : vector<1x128xf32> to vector<16x128xf32>
    %38 = arith.addf %35, %37 : vector<16x128xf32>
    %c0_26 = arith.constant 0 : index
    %c0_27 = arith.constant 0 : index
    %39 = vector.load %arg10[%c0_26, %c0_27] : memref<16x128xf32, #tpu.memory_space<vmem>>, vector<16x128xf32>
    tpu.vector_store %arg10[%c0_26, %c0_27], %38 {strides = array<i32>} : memref<16x128xf32, #tpu.memory_space<vmem>>, vector<16x128xf32>,
    return
  }
  func.func @transform_0(%arg0: i32) -> (i32, i32) {
    %c0_i32 = arith.constant 0 : i32
    %c0_i32_0 = arith.constant 0 : i32
    return %arg0, %c0_i32 : i32, i32
  }
  func.func @transform_1(%arg0: i32) -> (i32, i32) {
    %c0_i32 = arith.constant 0 : i32
    %c0_i32_0 = arith.constant 0 : i32
    %c0_i32_1 = arith.constant 0 : i32
    return %c0_i32, %c0_i32_0 : i32, i32
  }
  func.func @transform_2(%arg0: i32) -> (i32, i32) {
    %c0_i32 = arith.constant 0 : i32
    %c0_i32_0 = arith.constant 0 : i32
    %c0_i32_1 = arith.constant 0 : i32
    return %c0_i32, %c0_i32_0 : i32, i32
  }
  func.func @transform_3(%arg0: i32) -> (i32, i32) {
    %c0_i32 = arith.constant 0 : i32
    %c0_i32_0 = arith.constant 0 : i32
    %c0_i32_1 = arith.constant 0 : i32
    return %c0_i32, %c0_i32_0 : i32, i32
  }
  func.func @transform_4(%arg0: i32) -> (i32, i32) {
    %c0_i32 = arith.constant 0 : i32
    %c0_i32_0 = arith.constant 0 : i32
    %c0_i32_1 = arith.constant 0 : i32
    return %c0_i32, %c0_i32_0 : i32, i32
  }
  func.func @transform_5(%arg0: i32) -> (i32, i32) {
    %c0_i32 = arith.constant 0 : i32
    %c0_i32_0 = arith.constant 0 : i32
    %c0_i32_1 = arith.constant 0 : i32
    return %c0_i32, %c0_i32_0 : i32, i32
  }
  func.func @transform_6(%arg0: i32) -> (i32, i32) {
    %c0_i32 = arith.constant 0 : i32
    %c0_i32_0 = arith.constant 0 : i32
    %c0_i32_1 = arith.constant 0 : i32
    return %c0_i32, %c0_i32_0 : i32, i32
  }
  func.func @transform_7(%arg0: i32) -> (i32, i32) {
    %c0_i32 = arith.constant 0 : i32
    %c0_i32_0 = arith.constant 0 : i32
    %c0_i32_1 = arith.constant 0 : i32
    return %c0_i32, %c0_i32_0 : i32, i32
  }
  func.func @transform_8(%arg0: i32) -> (i32, i32) {
    %c0_i32 = arith.constant 0 : i32
    %c0_i32_0 = arith.constant 0 : i32
    %c0_i32_1 = arith.constant 0 : i32
    return %c0_i32, %c0_i32_0 : i32, i32
  }
  func.func @transform_9(%arg0: i32) -> (i32, i32) {
    %c0_i32 = arith.constant 0 : i32
    %c0_i32_0 = arith.constant 0 : i32
    return %arg0, %c0_i32 : i32, i32
  }
}

</mosaic_0001>

<bundles_post_ra>
// kernel: tpu_custom_call.1
= control target key start
LH: loop header
LB: loop body
LE: loop exit
PB: predicated region body
PF: predicated region fallthrough
CT: control target
= control target key end

     0   :  { %14 = vsyncpa [#allocation3], 0  ;;  %s1578_s0 = inlined_call_operand.hbm [shape: bf16[16,384], index: 0, kind: input, shape index: {}]   ;;  %s1579_s1 = inlined_call_operand.hbm [shape: bf16[384,256], index: 1, kind: input, shape index: {}]   ;;  %s1580_s2 = inlined_call_operand.vmem [shape: f32[1,256], index: 2, kind: input, shape index: {}]   ;;  %s1581_s3 = inlined_call_operand.hbm [shape: bf16[256,128], index: 3, kind: input, shape index: {}]   ;;  %s1582_s4 = inlined_call_operand.vmem [shape: f32[1,128], index: 4, kind: input, shape index: {}]   ;;  %s1583_s5 = inlined_call_operand.hbm [shape: bf16[128,128], index: 5, kind: input, shape index: {}]   ;;  %s1584_s6 = inlined_call_operand.vmem [shape: f32[1,128], index: 6, kind: input, shape index: {}]   ;;  %s1585_s7 = inlined_call_operand.hbm [shape: bf16[128,128], index: 7, kind: input, shape index: {}]   ;;  %s1586_s8 = inlined_call_operand.vmem [shape: f32[1,128], index: 8, kind: input, shape index: {}]   ;;  %s1587_s9 = inlined_call_operand.hbm [shape: f32[16,128], index: 9, kind: output, shape index: {}]  }
   0x1   :  { %15 = vsyncpa [#allocation6], 0 }
   0x2   :  { %16 = vsyncpa [#allocation9], 0 }
   0x3   :  { %17 = vsyncpa [#allocation4], 0  ;;  %s1394_s30 = smov [#allocation5]   ;;  %s1254_s13 = scalar_lea.hbm %s1579_s1, 6144 }
   0x4   :  { %s35_s10 = sshll.u32 %s1394_s30, 4  ;;  %p1255_p0 = scmp.ne.s32.totalorder %s1579_s1, %s1254_s13  ;;  %s36_s10 = int_to_ptr.vmem [resolvable:$true] %s35_s10 }
   0x5   :  { %p1258_p1 = scmp.lt.u32.totalorder %s1254_s13, %s1579_s1 }
   0x7   :  { %p1260_p2 = pnand %p1258_p1, %p1255_p0 }
   0x9   :  { %1263 = shalt.err (!%p1260_p2)
}
   0xa   :  { %s1264_s18 = scalar_lea.vmem %s36_s10, 6144  ;;  %p1269_p4 = scmp.lt.s32.totalorder %s36_s10, %s36_s10 }
   0xb   :  { %p1265_p3 = scmp.ne.s32.totalorder %s36_s10, %s1264_s18  ;;  %p1270_p5 = scmp.lt.s32.totalorder %s1264_s18, %s1264_s18 }
   0xd   :  { %p1271_p6 = por %p1270_p5, %p1269_p4 }
   0xf   :  { %p1272_p7 = pnand %p1271_p6, %p1265_p3 }
  0x11   :  { %1275 = shalt.err (!%p1272_p7)
}
  0x12   :  { %s1395_s19 = smov 128   ;;  %s1396_s20 = smov 8  }
  0x13   :  { %41 = dma.hbm_to_vmem [thread:$0]  %s1579_s1, 6144, %s36_s10, [#allocation6], %s1395_s19, %s1395_s19, %s1396_s20  }
  0x14   :  { %s1397_s23 = smov [#allocation8]   ;;  %s1398_s25 = smov [#allocation2]  }
  0x15   :  { %s63_s24 = sshll.u32 %s1397_s23, 4  ;;  %s23_s26 = sshll.u32 %s1398_s25, 4  ;;  %s64_s24 = int_to_ptr.vmem [resolvable:$true] %s63_s24  ;;  %s24_s26 = int_to_ptr.vmem [resolvable:$true] %s23_s26 }
  0x16   :  { %s1276_s29 = scalar_lea.hbm %s1583_s5, 1024 }
  0x17   :  { %p1277_p8 = scmp.ne.s32.totalorder %s1583_s5, %s1276_s29  ;;  %p1280_p9 = scmp.lt.u32.totalorder %s1276_s29, %s1583_s5 }
  0x19   :  { %p1282_p10 = pnand %p1280_p9, %p1277_p8 }
  0x1b   :  { %1285 = shalt.err (!%p1282_p10)
}
  0x1c   :  { %s1286_s1 = scalar_lea.vmem %s64_s24, 1024  ;;  %p1291_p12 = scmp.lt.s32.totalorder %s64_s24, %s64_s24 }
  0x1d   :  { %p1287_p11 = scmp.ne.s32.totalorder %s64_s24, %s1286_s1  ;;  %p1292_p13 = scmp.lt.s32.totalorder %s1286_s1, %s1286_s1 }
  0x1f   :  { %p1293_p0 = por %p1292_p13, %p1291_p12 }
  0x21   :  { %p1294_p1 = pnand %p1293_p0, %p1287_p11 }
  0x23   :  { %1297 = shalt.err (!%p1294_p1)
}
  0x24   :  { %s1399_s10 = smov 64   ;;  %s1400_s14 = smov 4  }
  0x25   :  { %69 = dma.hbm_to_vmem [thread:$0]  %s1583_s5, 1024, %s64_s24, [#allocation9], %s1399_s10, %s1399_s10, %s1400_s14  }
  0x26   :  { %s1298_s21 = scalar_lea.hbm %s1578_s0, 384 }
  0x27   :  { %p1299_p2 = scmp.ne.s32.totalorder %s1578_s0, %s1298_s21  ;;  %p1302_p3 = scmp.lt.u32.totalorder %s1298_s21, %s1578_s0 }
  0x29   :  { %p1304_p4 = pnand %p1302_p3, %p1299_p2 }
  0x2b   :  { %1307 = shalt.err (!%p1304_p4)
}
  0x2c   :  { %s1308_s28 = scalar_lea.vmem %s24_s26, 384  ;;  %p1313_p6 = scmp.lt.s32.totalorder %s24_s26, %s24_s26 }
  0x2d   :  { %p1309_p5 = scmp.ne.s32.totalorder %s24_s26, %s1308_s28  ;;  %p1314_p7 = scmp.lt.s32.totalorder %s1308_s28, %s1308_s28 }
  0x2f   :  { %p1315_p8 = por %p1314_p7, %p1313_p6 }
  0x31   :  { %p1316_p9 = pnand %p1315_p8, %p1309_p5 }
  0x33   :  { %1319 = shalt.err (!%p1316_p9)
}
  0x34   :  { %s1401_s5 = smov 192   ;;  %s1402_s24 = smov 12  }
  0x35   :  { %29 = dma.hbm_to_vmem [thread:$0]  %s1578_s0, 384, %s24_s26, [#allocation3], %s1401_s5, %s1401_s5, %s1402_s24  }
  0x36   :  { %s1403_s11 = smov [#allocation7]   ;;  %s1404_s13 = smov [#allocation10]  }
  0x37   :  { %s49_s12 = sshll.u32 %s1403_s11, 4  ;;  %s77_s1 = sshll.u32 %s1404_s13, 4  ;;  %s50_s12 = int_to_ptr.vmem [resolvable:$true] %s49_s12  ;;  %s78_s1 = int_to_ptr.vmem [resolvable:$true] %s77_s1 }
  0x38   :  { %s1320_s17 = scalar_lea.hbm %s1581_s3, 2048 }
  0x39   :  { %p1321_p10 = scmp.ne.s32.totalorder %s1581_s3, %s1320_s17  ;;  %p1324_p11 = scmp.lt.u32.totalorder %s1320_s17, %s1581_s3 }
  0x3b   :  { %p1326_p12 = pnand %p1324_p11, %p1321_p10 }
  0x3d   :  { %1329 = shalt.err (!%p1326_p12)
}
  0x3e   :  { %s1330_s0 = scalar_lea.vmem %s50_s12, 2048  ;;  %p1335_p0 = scmp.lt.s32.totalorder %s50_s12, %s50_s12 }
  0x3f   :  { %p1331_p13 = scmp.ne.s32.totalorder %s50_s12, %s1330_s0  ;;  %p1336_p1 = scmp.lt.s32.totalorder %s1330_s0, %s1330_s0 }
  0x41   :  { %p1337_p2 = por %p1336_p1, %p1335_p0 }
  0x43   :  { %p1338_p3 = pnand %p1337_p2, %p1331_p13 }
  0x45   :  { %1341 = shalt.err (!%p1338_p3)
}
  0x46   :  { %55 = dma.hbm_to_vmem [thread:$0]  %s1581_s3, 2048, %s50_s12, [#allocation6], %s1399_s10, %s1399_s10, %s1400_s14  }
  0x47   :  { %s1342_s5 = scalar_lea.hbm %s1585_s7, 1024 }
  0x48   :  { %p1343_p4 = scmp.ne.s32.totalorder %s1585_s7, %s1342_s5  ;;  %p1346_p5 = scmp.lt.u32.totalorder %s1342_s5, %s1585_s7 }
  0x4a   :  { %p1348_p6 = pnand %p1346_p5, %p1343_p4 }
  0x4c   :  { %1351 = shalt.err (!%p1348_p6)
}
  0x4d   :  { %s1352_s13 = scalar_lea.vmem %s78_s1, 1024  ;;  %p1357_p8 = scmp.lt.s32.totalorder %s78_s1, %s78_s1 }
  0x4e   :  { %p1353_p7 = scmp.ne.s32.totalorder %s78_s1, %s1352_s13  ;;  %p1358_p9 = scmp.lt.s32.totalorder %s1352_s13, %s1352_s13 }
  0x50   :  { %p1359_p10 = por %p1358_p9, %p1357_p8 }
  0x52   :  { %p1360_p11 = pnand %p1359_p10, %p1353_p7 }
  0x54   :  { %1363 = shalt.err (!%p1360_p11)
}
  0x55   :  { %83 = dma.hbm_to_vmem [thread:$0]  %s1585_s7, 1024, %s78_s1, [#allocation9], %s1399_s10, %s1399_s10, %s1400_s14  }
  0x56   :  { %1386 = dma.done.wait [#allocation3], 384  }
  0x57   :  { %1387 = vsyncadd [#allocation3], 4294966912 }
  0x58   :  { %1388 = dma.done.wait [#allocation6], 8192  }
  0x59   :  { %1389 = vsyncadd [#allocation6], 4294959104 }
  0x5a   :  { %1390 = dma.done.wait [#allocation9], 2048  }
  0x5b   :  { %1391 = vsyncadd [#allocation9], 4294965248  ;;  %v1146_v0 = vld [vmem:[#allocation5 + $0x4] ss:$8 sps:$4 sm:$0xff]   ;;  %v1148_v1 = vld [vmem:[#allocation5] ss:$8 sps:$4 sm:$0xff]  }
  0x5c   :  { %422 = vmatprep.subr.bf16.mxu0 %v1146_v0  ;;  %v1149_v2 = vld [vmem:[#allocation5 + $0x14] ss:$8 sps:$4 sm:$0xff]   ;;  %v1151_v3 = vld [vmem:[#allocation5 + $0x10] ss:$8 sps:$4 sm:$0xff]   ;;  %v1152_v4 = vld [vmem:[#allocation5 + $0x24] ss:$8 sps:$4 sm:$0xff]  }
  0x5d   :  { %423 = vmatpush1.bf16.msra.mxu0 %v1148_v1  ;;  %v1154_v5 = vld [vmem:[#allocation5 + $0x20] ss:$8 sps:$4 sm:$0xff]   ;;  %v1155_v6 = vld [vmem:[#allocation5 + $0x34] ss:$8 sps:$4 sm:$0xff]   ;;  %v1157_v7 = vld [vmem:[#allocation5 + $0x30] ss:$8 sps:$4 sm:$0xff]  }
  0x5e   :  { %424 = vmatprep.subr.bf16.mxu0 %v1149_v2  ;;  %v1158_v8 = vld [vmem:[#allocation5 + $0x44] ss:$8 sps:$4 sm:$0xff]   ;;  %v1160_v9 = vld [vmem:[#allocation5 + $0x40] ss:$8 sps:$4 sm:$0xff]   ;;  %v1161_v10 = vld [vmem:[#allocation5 + $0x54] ss:$8 sps:$4 sm:$0xff]  }
  0x5f   :  { %v1163_v11 = vld [vmem:[#allocation5 + $0x50] ss:$8 sps:$4 sm:$0xff]   ;;  %v1164_v12 = vld [vmem:[#allocation5 + $0x64] ss:$8 sps:$4 sm:$0xff]   ;;  %v1166_v14 = vld [vmem:[#allocation5 + $0x60] ss:$8 sps:$4 sm:$0xff]  }
  0x60   :  { %v1196_v13 = vld [vmem:[#allocation2 + $0x4] ss:$12 sps:$4 sm:$0xff]   ;;  %v1167_v15 = vld [vmem:[#allocation5 + $0x74] ss:$8 sps:$4 sm:$0xff]   ;;  %v1172_v18 = vld [vmem:[#allocation5 + $0x80] ss:$8 sps:$4 sm:$0xff]  }
  0x61   :  { %425 = vmatpush1.bf16.msra.mxu0 %v1151_v3  ;;  %454 = vmatprep.mubr.bf16.mxu0 %v1196_v13  ;;  %v1169_v16 = vld [vmem:[#allocation5 + $0x70] ss:$8 sps:$4 sm:$0xff]   ;;  %v1170_v17 = vld [vmem:[#allocation5 + $0x84] ss:$8 sps:$4 sm:$0xff]   ;;  %v1173_v19 = vld [vmem:[#allocation5 + $0x94] ss:$8 sps:$4 sm:$0xff]  }
  0x62   :  { %426 = vmatprep.subr.bf16.mxu0 %v1152_v4  ;;  %v1175_v20 = vld [vmem:[#allocation5 + $0x90] ss:$8 sps:$4 sm:$0xff]   ;;  %v1176_v21 = vld [vmem:[#allocation5 + $0xa4] ss:$8 sps:$4 sm:$0xff]   ;;  %v1178_v24 = vld [vmem:[#allocation5 + $0xa0] ss:$8 sps:$4 sm:$0xff]  }
  0x63   :  { %v1222_v22 = vld [vmem:[#allocation7 + $0x40] sm:$0xff]   ;;  %v1224_v25 = vld [vmem:[#allocation7 + $0x48] sm:$0xff]   ;;  %v1226_v27 = vld [vmem:[#allocation7 + $0x50] sm:$0xff]   ;;  %v1405_v48 = vmov 0   ;;  %v1406_v4 = vmov 0.0   ;;  %vm1407_vm4 = vmmov 0  }
  0x64   :  { %v1223_v23 = vld [vmem:[#allocation7] sm:$0xff]   ;;  %1043 = vmatprep.subr.bf16.mxu1 %v1222_v22  ;;  %v1225_v26 = vld [vmem:[#allocation7 + $0x8] sm:$0xff]   ;;  %v1179_v28 = vld [vmem:[#allocation5 + $0xb4] ss:$8 sps:$4 sm:$0xff]  }
  0x65   :  { %427 = vmatpush1.bf16.msra.mxu0 %v1154_v5  ;;  %1044 = vmatpush3.bf16.msra.mxu1 %v1223_v23  ;;  %v1181_v29 = vld [vmem:[#allocation5 + $0xb0] ss:$8 sps:$4 sm:$0xff]   ;;  %v1182_v32 = vld [vmem:[#allocation5 + $0xc4] ss:$8 sps:$4 sm:$0xff]   ;;  %v1184_v34 = vld [vmem:[#allocation5 + $0xc0] ss:$8 sps:$4 sm:$0xff]   ;;  %v156_v5 = vlaneseq }
  0x66   :  { %428 = vmatprep.subr.bf16.mxu0 %v1155_v6  ;;  %1045 = vmatprep.subr.bf16.mxu1 %v1224_v25  ;;  %v1227_v30 = vld [vmem:[#allocation7 + $0x10] sm:$0xff]   ;;  %v1228_v31 = vld [vmem:[#allocation7 + $0x58] sm:$0xff]   ;;  %v1230_v35 = vld [vmem:[#allocation7 + $0x60] sm:$0xff]  }
  0x67   :  { %v1229_v33 = vld [vmem:[#allocation7 + $0x18] sm:$0xff]   ;;  %v1231_v37 = vld [vmem:[#allocation7 + $0x20] sm:$0xff]   ;;  %v1194_v44 = vld [vmem:[#allocation2] ss:$12 sps:$4 sm:$0xff]   ;;  %v157_v6 = vshrl.u32 %v156_v5, 7 }
  0x68   :  { %v1185_v36 = vld [vmem:[#allocation5 + $0xd4] ss:$8 sps:$4 sm:$0xff]   ;;  %v1187_v38 = vld [vmem:[#allocation5 + $0xd0] ss:$8 sps:$4 sm:$0xff]   ;;  %v1188_v39 = vld [vmem:[#allocation5 + $0xe4] ss:$8 sps:$4 sm:$0xff]  }
  0x69   :  { %429 = vmatpush1.bf16.msra.mxu0 %v1157_v7  ;;  %1046 = vmatpush3.bf16.msra.mxu1 %v1225_v26  ;;  %v1190_v40 = vld [vmem:[#allocation5 + $0xe0] ss:$8 sps:$4 sm:$0xff]   ;;  %v1191_v41 = vld [vmem:[#allocation5 + $0xf4] ss:$8 sps:$4 sm:$0xff]   ;;  %v1193_v42 = vld [vmem:[#allocation5 + $0xf0] ss:$8 sps:$4 sm:$0xff]  }
  0x6a   :  { %430 = vmatprep.subr.bf16.mxu0 %v1158_v8  ;;  %1047 = vmatprep.subr.bf16.mxu1 %v1226_v27  ;;  %v1199_v43 = vld [vmem:[#allocation5 + $0x104] ss:$8 sps:$4 sm:$0xff]   ;;  %v1197_v45 = vld [vmem:[#allocation5 + $0x100] ss:$8 sps:$4 sm:$0xff]   ;;  %v1202_v46 = vld [vmem:[#allocation5 + $0x114] ss:$8 sps:$4 sm:$0xff]  }
  0x6b   :  { %v1200_v47 = vld [vmem:[#allocation5 + $0x110] ss:$8 sps:$4 sm:$0xff]   ;;  %v1205_v49 = vld [vmem:[#allocation5 + $0x124] ss:$8 sps:$4 sm:$0xff]   ;;  %v1203_v50 = vld [vmem:[#allocation5 + $0x120] ss:$8 sps:$4 sm:$0xff]  }
  0x6c   :  { %v1208_v51 = vld [vmem:[#allocation5 + $0x134] ss:$8 sps:$4 sm:$0xff]   ;;  %v1206_v52 = vld [vmem:[#allocation5 + $0x130] ss:$8 sps:$4 sm:$0xff]   ;;  %v1211_v53 = vld [vmem:[#allocation5 + $0x144] ss:$8 sps:$4 sm:$0xff]  }
  0x6d   :  { %431 = vmatpush1.bf16.msra.mxu0 %v1160_v9  ;;  %1048 = vmatpush3.bf16.msra.mxu1 %v1227_v30  ;;  %v1209_v54 = vld [vmem:[#allocation5 + $0x140] ss:$8 sps:$4 sm:$0xff]   ;;  %v1214_v55 = vld [vmem:[#allocation5 + $0x154] ss:$8 sps:$4 sm:$0xff]   ;;  %v1212_v56 = vld [vmem:[#allocation5 + $0x150] ss:$8 sps:$4 sm:$0xff]  }
  0x6e   :  { %432 = vmatprep.subr.bf16.mxu0 %v1161_v10  ;;  %1049 = vmatprep.subr.bf16.mxu1 %v1228_v31  ;;  %v1217_v57 = vld [vmem:[#allocation5 + $0x164] ss:$8 sps:$4 sm:$0xff]   ;;  %v1215_v58 = vld [vmem:[#allocation5 + $0x160] ss:$8 sps:$4 sm:$0xff]   ;;  %v1220_v59 = vld [vmem:[#allocation5 + $0x174] ss:$8 sps:$4 sm:$0xff]  }
  0x6f   :  { %v1218_v60 = vld [vmem:[#allocation5 + $0x170] ss:$8 sps:$4 sm:$0xff]   ;;  %v1232_v62 = vld [vmem:[#allocation7 + $0x68] sm:$0xff]   ;;  %v158_v7 = vsub.s32 0, %v157_v6  ;;  %v162_v9 = vsub.s32 1, %v157_v6  ;;  %v1238_v30 = vld [vmem:[#allocation8] sm:$0xff]  }
  0x70   :  { %v1221_v61 = vld [vmem:[#allocation2 + $0x8] ss:$12 sps:$4 sm:$0xff]   ;;  %v1233_v63 = vld [vmem:[#allocation7 + $0x28] sm:$0xff]  }
  0x71   :  { %433 = vmatpush1.bf16.msra.mxu0 %v1163_v11  ;;  %1050 = vmatpush3.bf16.msra.mxu1 %v1229_v33  ;;  %v1234_v0 = vld [vmem:[#allocation7 + $0x70] sm:$0xff]   ;;  %v1236_v2 = vld [vmem:[#allocation7 + $0x78] sm:$0xff]   ;;  %v154_v8 = vld [vmem:[%s1580_s2] sm:$0x3] }
  0x72   :  { %434 = vmatprep.subr.bf16.mxu0 %v1164_v12  ;;  %1051 = vmatprep.subr.bf16.mxu1 %v1230_v35  ;;  %v1235_v1 = vld [vmem:[#allocation7 + $0x30] sm:$0xff]   ;;  %v1237_v3 = vld [vmem:[#allocation7 + $0x38] sm:$0xff]   ;;  %v159_v10 = vrot.slane %v154_v8, %v158_v7  ;;  %v163_v11 = vrot.slane %v154_v8, %v162_v9  ;;  %v1239_v31 = vld [vmem:[#allocation8 + $0x8] sm:$0xff]  }
  0x73   :  { %v1241_v33 = vld [vmem:[#allocation8 + $0x18] sm:$0xff]   ;;  %v1243_v35 = vld [vmem:[#allocation8 + $0x28] sm:$0xff]  }
  0x75   :  { %435 = vmatpush1.bf16.msra.mxu0 %v1166_v14  ;;  %1052 = vmatpush3.bf16.msra.mxu1 %v1231_v37  ;;  %v1245_v37 = vld [vmem:[#allocation8 + $0x38] sm:$0xff]  }
  0x76   :  { %436 = vmatprep.subr.bf16.mxu0 %v1167_v15  ;;  %1053 = vmatprep.subr.bf16.mxu1 %v1232_v62 }
  0x79   :  { %437 = vmatpush1.bf16.msra.mxu0 %v1169_v16  ;;  %1054 = vmatpush3.bf16.msra.mxu1 %v1233_v63 }
  0x7a   :  { %438 = vmatprep.subr.bf16.mxu0 %v1170_v17  ;;  %1055 = vmatprep.subr.bf16.mxu1 %v1234_v0 }
  0x7d   :  { %439 = vmatpush1.bf16.msra.mxu0 %v1172_v18  ;;  %1056 = vmatpush3.bf16.msra.mxu1 %v1235_v1 }
  0x7e   :  { %440 = vmatprep.subr.bf16.mxu0 %v1173_v19  ;;  %1057 = vmatprep.subr.bf16.mxu1 %v1236_v2 }
  0x81   :  { %441 = vmatpush1.bf16.msra.mxu0 %v1175_v20  ;;  %1058 = vmatpush3.bf16.msra.mxu1 %v1237_v3 }
  0x82   :  { %442 = vmatprep.subr.bf16.mxu0 %v1176_v21  ;;  %1083 = vmatprep.subr.bf16.mxu1 %v1406_v4 }
  0x85   :  { %443 = vmatpush1.bf16.msra.mxu0 %v1178_v24 }
  0x86   :  { %444 = vmatprep.subr.bf16.mxu0 %v1179_v28 }
  0x89   :  { %445 = vmatpush1.bf16.msra.mxu0 %v1181_v29 }
  0x8a   :  { %446 = vmatprep.subr.bf16.mxu0 %v1182_v32  ;;  %v1240_v32 = vld [vmem:[#allocation8 + $0x10] sm:$0xff]  }
  0x8d   :  { %447 = vmatpush1.bf16.msra.mxu0 %v1184_v34  ;;  %v1242_v34 = vld [vmem:[#allocation8 + $0x20] sm:$0xff]  }
  0x8e   :  { %448 = vmatprep.subr.bf16.mxu0 %v1185_v36  ;;  %v1244_v36 = vld [vmem:[#allocation8 + $0x30] sm:$0xff]  }
  0x91   :  { %449 = vmatpush1.bf16.msra.mxu0 %v1187_v38 }
  0x92   :  { %450 = vmatprep.subr.bf16.mxu0 %v1188_v39  ;;  %v1008_v39 = vld [vmem:[%s1582_s4] ss:$0 sm:$0xff] }
  0x95   :  { %451 = vmatpush1.bf16.msra.mxu0 %v1190_v40 }
  0x96   :  { %452 = vmatprep.subr.bf16.mxu0 %v1191_v41 }
  0x99   :  { %453 = vmatpush1.bf16.msra.mxu0 %v1193_v42 }
  0x9a   :  { %465 = vmatprep.subr.bf16.mxu0 %v1199_v43 }
  0x9c   :  { %455 = vmatmul.mubr.bf16.vlgmr.msra.gmra.mrb[0].mxu0 %v1194_v44 }
  0x9d   :  { %466 = vmatpush1.bf16.msra.mxu0 %v1197_v45  ;;  %497 = vmatprep.mubr.bf16.mxu0 %v1405_v48 }
  0x9e   :  { %467 = vmatprep.subr.bf16.mxu0 %v1202_v46 }
  0xa1   :  { %468 = vmatpush1.bf16.msra.mxu0 %v1200_v47 }
  0xa2   :  { %469 = vmatprep.subr.bf16.mxu0 %v1205_v49 }
  0xa5   :  { %470 = vmatpush1.bf16.msra.mxu0 %v1203_v50 }
  0xa6   :  { %471 = vmatprep.subr.bf16.mxu0 %v1208_v51  ;;  %v1246_v51 = vld [vmem:[#allocation10] sm:$0xff]  }
  0xa9   :  { %472 = vmatpush1.bf16.msra.mxu0 %v1206_v52 }
  0xaa   :  { %473 = vmatprep.subr.bf16.mxu0 %v1211_v53  ;;  %v1247_v53 = vld [vmem:[#allocation10 + $0x8] sm:$0xff]  }
  0xad   :  { %474 = vmatpush1.bf16.msra.mxu0 %v1209_v54  ;;  %v1248_v54 = vld [vmem:[#allocation10 + $0x10] sm:$0xff]  }
  0xae   :  { %475 = vmatprep.subr.bf16.mxu0 %v1214_v55  ;;  %v1249_v55 = vld [vmem:[#allocation10 + $0x18] sm:$0xff]  }
  0xb1   :  { %476 = vmatpush1.bf16.msra.mxu0 %v1212_v56  ;;  %v1250_v56 = vld [vmem:[#allocation10 + $0x20] sm:$0xff]  }
  0xb2   :  { %477 = vmatprep.subr.bf16.mxu0 %v1217_v57  ;;  %v1251_v57 = vld [vmem:[#allocation10 + $0x28] sm:$0xff]  }
  0xb5   :  { %478 = vmatpush1.bf16.msra.mxu0 %v1215_v58  ;;  %v1252_v58 = vld [vmem:[#allocation10 + $0x30] sm:$0xff]  }
  0xb6   :  { %479 = vmatprep.subr.bf16.mxu0 %v1220_v59  ;;  %v1253_v59 = vld [vmem:[#allocation10 + $0x38] sm:$0xff]  }
  0xb9   :  { %480 = vmatpush1.bf16.msra.mxu0 %v1218_v60  ;;  %v1025_v60 = vld [vmem:[%s1584_s6] ss:$0 sm:$0xff]  ;;  %s1408_s6 = smov [#allocation11]  }
  0xba   :  { %s943_s17 = sshll.u32 %s1408_s6, 4  ;;  %s944_s17 = int_to_ptr.vmem [resolvable:$true] %s943_s17 }
  0xbb   :  { %s1364_s18 = scalar_lea.vmem %s944_s17, 256  ;;  %p1369_p13 = scmp.lt.s32.totalorder %s944_s17, %s944_s17 }
  0xbc   :  { %498 = vmatmul.mubr.bf16.vlgmr.msra.gmra.mrb[0].mxu0 %v1221_v61  ;;  %p1365_p12 = scmp.ne.s32.totalorder %s944_s17, %s1364_s18  ;;  %p1370_p0 = scmp.lt.s32.totalorder %s1364_s18, %s1364_s18 }
  0xbe   :  { %p1371_p1 = por %p1370_p0, %p1369_p13 }
  0xc0   :  { %p1372_p2 = pnand %p1371_p1, %p1365_p12 }
 0x18f   :  { %v499_v12 = vpop.f32.mrb[0].mxu0 }
 0x190   :  { %v1123_v13 = vadd.f32 %v499_v12, %v159_v10  ;;  %v501_v14 = vpop.f32.mrb[1].mxu0 }
 0x191   :  { %v1124_v15 = vadd.f32 %v501_v14, %v163_v11  ;;  %v503_v16 = vpop.f32.mrb[2].mxu0 }
 0x192   :  { %v512_v17 = vmul.f32 0.01, %v1123_v13  ;;  %v1125_v18 = vadd.f32 %v503_v16, %v159_v10  ;;  %v505_v19 = vpop.f32.mrb[3].mxu0  ;;  %vm508_vm0 = vcmp.gt.f32.partialorder %v1123_v13, 0.0 }
 0x193   :  { %v513_v20 = vmul.f32 0.01, %v1124_v15  ;;  %v1126_v21 = vadd.f32 %v505_v19, %v163_v11  ;;  %vm509_vm2 = vcmp.gt.f32.partialorder %v1124_v15, 0.0 }
 0x194   :  { %vm510_vm1 = vcmp.gt.f32.partialorder %v1125_v18, 0.0  ;;  %v514_v22 = vmul.f32 0.01, %v1125_v18  ;;  %v516_v24 = vsel %vm508_vm0, %v1123_v13, %v512_v17 }
 0x195   :  { %v515_v23 = vmul.f32 0.01, %v1126_v21  ;;  %vm511_vm3 = vcmp.gt.f32.partialorder %v1126_v21, 0.0  ;;  %v517_v26 = vsel %vm509_vm2, %v1124_v15, %v513_v20 }
 0x196   :  { %v518_v25 = vsel %vm510_vm1, %v1125_v18, %v514_v22 }
 0x197   :  { %v519_v27 = vsel %vm511_vm3, %v1126_v21, %v515_v23  ;;  %v520_v28 = vpack.c.bf16 %v518_v25, %v516_v24 }
 0x198   :  { %v521_v29 = vpack.c.bf16 %v519_v27, %v517_v26 }
 0x19a   :  { %689 = vmatprep.mubr.bf16.mxu1 %v521_v29 }
 0x19b   :  { %690 = vmatmul.mubr.bf16.vlgmr.msra.gmra.mrb[0].mxu1 %v520_v28 }
 0x19c   :  { %1084 = vmatpush3.bf16.msra.mxu1 %v1238_v30  ;;  %1099 = vmatprep.mubr.msk.bf16.mxu1 %vm1407_vm4, %v1406_v4 }
 0x19d   :  { %1085 = vmatprep.subr.bf16.mxu1 %v1406_v4 }
 0x1a0   :  { %1086 = vmatpush3.bf16.msra.mxu1 %v1239_v31 }
 0x1a1   :  { %1087 = vmatprep.subr.bf16.mxu1 %v1406_v4 }
 0x1a4   :  { %1088 = vmatpush3.bf16.msra.mxu1 %v1240_v32 }
 0x1a5   :  { %1089 = vmatprep.subr.bf16.mxu1 %v1406_v4 }
 0x1a8   :  { %1090 = vmatpush3.bf16.msra.mxu1 %v1241_v33 }
 0x1a9   :  { %1091 = vmatprep.subr.bf16.mxu1 %v1406_v4 }
 0x1ac   :  { %1092 = vmatpush3.bf16.msra.mxu1 %v1242_v34 }
 0x1ad   :  { %1093 = vmatprep.subr.bf16.mxu1 %v1406_v4 }
 0x1b0   :  { %1094 = vmatpush3.bf16.msra.mxu1 %v1243_v35 }
 0x1b1   :  { %1095 = vmatprep.subr.bf16.mxu1 %v1406_v4 }
 0x1b4   :  { %1096 = vmatpush3.bf16.msra.mxu1 %v1244_v36 }
 0x1b5   :  { %1097 = vmatprep.subr.bf16.mxu1 %v1406_v4 }
 0x1b8   :  { %1098 = vmatpush3.bf16.msra.mxu1 %v1245_v37 }
 0x1b9   :  { %1103 = vmatprep.subr.bf16.mxu1 %v1406_v4 }
 0x26e   :  { %v1059_v38 = vpop.f32.mrb[0].mxu1 }
 0x26f   :  { %v1060_v40 = vpop.f32.mrb[1].mxu1 }
 0x270   :  { %v1061_v41 = vadd.f32 %v1060_v40, %v1059_v38  ;;  %v1062_v42 = vpop.f32.mrb[2].mxu1 }
 0x271   :  { %v1063_v43 = vpop.f32.mrb[3].mxu1 }
 0x272   :  { %v692_v44 = vadd.f32 %v1061_v41, %v1008_v39  ;;  %v1064_v45 = vadd.f32 %v1063_v43, %v1062_v42 }
 0x274   :  { %v700_v46 = vmul.f32 0.01, %v692_v44  ;;  %v695_v47 = vadd.f32 %v1064_v45, %v1008_v39  ;;  %vm698_vm5 = vcmp.gt.f32.partialorder %v692_v44, 0.0 }
 0x276   :  { %vm699_vm6 = vcmp.gt.f32.partialorder %v695_v47, 0.0  ;;  %v701_v48 = vmul.f32 0.01, %v695_v47  ;;  %v702_v49 = vsel %vm698_vm5, %v692_v44, %v700_v46 }
 0x278   :  { %v703_v50 = vsel %vm699_vm6, %v695_v47, %v701_v48 }
 0x279   :  { %v704_v52 = vpack.c.bf16 %v703_v50, %v702_v49 }
 0x27b   :  { %1100 = vmatmul.mubr.bf16.vlgmr.msra.gmra.mrb[4].mxu1 %v704_v52 }
 0x27c   :  { %1104 = vmatpush3.bf16.msra.mxu1 %v1246_v51  ;;  %1119 = vmatprep.mubr.msk.bf16.mxu1 %vm1407_vm4, %v1406_v4 }
 0x27d   :  { %1105 = vmatprep.subr.bf16.mxu1 %v1406_v4 }
 0x280   :  { %1106 = vmatpush3.bf16.msra.mxu1 %v1247_v53 }
 0x281   :  { %1107 = vmatprep.subr.bf16.mxu1 %v1406_v4 }
 0x284   :  { %1108 = vmatpush3.bf16.msra.mxu1 %v1248_v54 }
 0x285   :  { %1109 = vmatprep.subr.bf16.mxu1 %v1406_v4 }
 0x288   :  { %1110 = vmatpush3.bf16.msra.mxu1 %v1249_v55 }
 0x289   :  { %1111 = vmatprep.subr.bf16.mxu1 %v1406_v4 }
 0x28c   :  { %1112 = vmatpush3.bf16.msra.mxu1 %v1250_v56 }
 0x28d   :  { %1113 = vmatprep.subr.bf16.mxu1 %v1406_v4 }
 0x290   :  { %1114 = vmatpush3.bf16.msra.mxu1 %v1251_v57 }
 0x291   :  { %1115 = vmatprep.subr.bf16.mxu1 %v1406_v4 }
 0x294   :  { %1116 = vmatpush3.bf16.msra.mxu1 %v1252_v58 }
 0x295   :  { %1117 = vmatprep.subr.bf16.mxu1 %v1406_v4  ;;  %v1034_v4 = vld [vmem:[%s1586_s8] ss:$0 sm:$0xff] }
 0x298   :  { %1118 = vmatpush3.bf16.msra.mxu1 %v1253_v59 }
 0x34e   :  { %v810_v61 = vpop.f32.mrb[4].mxu1 }
 0x34f   :  { %v811_v62 = vadd.f32 %v1025_v60, %v810_v61  ;;  %v1101_v63 = vpop.f32.mrb[5].mxu1 }
 0x350   :  { %v813_v0 = vpop.f32.mrb[6].mxu1 }
 0x351   :  { %v819_v1 = vmul.f32 0.01, %v811_v62  ;;  %v814_v2 = vadd.f32 %v1025_v60, %v813_v0  ;;  %v1102_v3 = vpop.f32.mrb[7].mxu1  ;;  %vm817_vm7 = vcmp.gt.f32.partialorder %v811_v62, 0.0 }
 0x353   :  { %vm818_vm8 = vcmp.gt.f32.partialorder %v814_v2, 0.0  ;;  %v820_v5 = vmul.f32 0.01, %v814_v2  ;;  %v821_v6 = vsel %vm817_vm7, %v811_v62, %v819_v1 }
 0x355   :  { %v822_v7 = vsel %vm818_vm8, %v814_v2, %v820_v5 }
 0x356   :  { %v823_v8 = vpack.c.bf16 %v822_v7, %v821_v6 }
 0x358   :  { %1120 = vmatmul.mubr.bf16.vlgmr.msra.gmra.mrb[8].mxu1 %v823_v8 }
 0x42b   :  { %v929_v9 = vpop.f32.mrb[8].mxu1 }
 0x42c   :  { %v930_v10 = vadd.f32 %v1034_v4, %v929_v9  ;;  %v1121_v11 = vpop.f32.mrb[9].mxu1 }
 0x42d   :  { %v932_v12 = vpop.f32.mrb[10].mxu1 }
 0x42e   :  { %936 = vst [vmem:[#allocation11] sm:$0xff] %v930_v10  ;;  %v933_v13 = vadd.f32 %v1034_v4, %v932_v12  ;;  %v1122_v14 = vpop.f32.mrb[11].mxu1 }
 0x430   :  { %937 = vst [vmem:[#allocation11 + $0x8] sm:$0xff] %v933_v13 }
 0x431   :  { %1375 = shalt.err (!%p1372_p2)
}
 0x432   :  { %s1376_s22 = scalar_lea.hbm %s1587_s9, 256 }
 0x433   :  { %p1377_p3 = scmp.ne.s32.totalorder %s1587_s9, %s1376_s22  ;;  %p1380_p4 = scmp.lt.u32.totalorder %s1376_s22, %s1587_s9 }
 0x435   :  { %p1382_p5 = pnand %p1380_p4, %p1377_p3 }
 0x437   :  { %1385 = shalt.err (!%p1382_p5)
}
 0x438   :  { %949 = dma.vmem_to_hbm [thread:$0]  %s944_s17, 256, %s1587_s9, [#allocation4], %s1395_s19, %s1395_s19, %s1396_s20  }
 0x439   :  { %1392 = dma.done.wait [#allocation4], 256  }
 0x43a   :  { %1393 = vsyncadd [#allocation4], 4294967040 }
 0x43b   :  { %953 = vsyncpa [#allocation3], 1 }
 0x43c   :  { %954 = vsyncpa [#allocation6], 1 }
 0x43d   :  { %955 = vsyncpa [#allocation9], 1 }
 0x43e   :  { %956 = vsyncpa [#allocation4], 1 }

</bundles_post_ra>
